<compile_context>
chip_gen: v5e
topology: v5e:2x2
jax: 0.10.0
libtpu: 0.0.40
codegen_flags: <defaults>
</compile_context>

<pallas_src>
import jax
import jax.numpy as jnp
from jax.experimental import pallas as pl
from jax.experimental.pallas import tpu as pltpu

# ---- config mirroring ScaleGMN_GNN.__init__ (small synthetic sizes) --------
LAYER_LAYOUT = (4, 8, 4)                 # model_args['layer_layout']
LAYER_IDX = (0, 4, 12, 16)               # cumulative node offsets (layer_idx)
N_NODES = LAYER_IDX[-1]                  # 16
D_NODE = 4                               # graph_init.d_node
D_EDGE = 4                               # graph_init.d_edge
D_HID = 32                               # gnn_args.d_hid
NUM_LAYERS = 3                           # model_args.num_layers
LAST_LAYER_NODES = LAYER_IDX[-1] - LAYER_IDX[-2]     # 4
D_READOUT_IN = LAST_LAYER_NODES * D_HID              # 128 (only_last_layer)
D_READOUT_HID = 64
D_OUT = 8
BATCH = 2
BN = BATCH * N_NODES                     # 32


# ---------------------------- fused Pallas kernel ----------------------------
def _fused_forward_kernel(x_ref, e_ref, abd_ref, whv_ref, wes_ref, bias_ref,
                          w1w_ref, m_ref, s_ref, sel_ref, b1_ref, w2_ref,
                          b2_ref, o_ref):
    f32 = jnp.float32

    # Node features already zero-padded d_node -> d_hid in the wrapper.
    h = x_ref[...]                                              # (BN, D_HID)
    a_bd = abd_ref[...]                                         # (BN, BN) block-diag

    # Edge contributions of ALL layers in one matmul:
    #   e_ref[r, :] = [a_r0*e_r0 | a_r1*e_r1 | ... ]
    #   wes         = [tile(We_0,(N,1)) | tile(We_1,(N,1)) | tile(We_2,(N,1))]
    # column block l equals sum_j a_rj * e_rj @ We_l (layer-invariant since
    # update_edge_attr=False).
    h_edge_all = jnp.dot(e_ref[...], wes_ref[...],
                         preferred_element_type=f32)            # (BN, L*D_HID)

    # GNN layers; h stays resident in VMEM/registers across layers.
    for l in range(NUM_LAYERS):
        packed = jnp.dot(h, whv_ref[l], preferred_element_type=f32)  # (BN, 3*D_HID)
        h_lin = packed[:, :D_HID] + h_edge_all[:, l * D_HID:(l + 1) * D_HID]
        msg = packed[:, D_HID:2 * D_HID]
        skip = packed[:, 2 * D_HID:]            # h_old @ Wskip (zeros for l=0)
        h_agg = jnp.dot(a_bd, msg, preferred_element_type=f32)
        h = jnp.maximum(h_lin + h_agg + bias_ref[l], 0.0) + skip

    # Readout (readout_range == 'last_layer') without any sublane->lane
    # relayout: Y[row, k-block] = h[row] @ W1_block_k; the mask keeps only the
    # row matching node k of the last layer; `sel` sums the last-layer rows of
    # each batch element; `s` (stacked identities) sums the column blocks.
    y = jnp.dot(h, w1w_ref[...], preferred_element_type=f32)    # (BN, LAST*D_RH)
    z = jnp.dot(sel_ref[...], y * m_ref[...],
                preferred_element_type=f32)                     # (B, LAST*D_RH)
    r1_pre = jnp.dot(z, s_ref[...], preferred_element_type=f32) # (B, D_RH)
    r1 = jnp.maximum(r1_pre + b1_ref[...], 0.0)
    out = jnp.dot(r1, w2_ref[...], preferred_element_type=f32) + b2_ref[...]
    o_ref[...] = out.astype(o_ref.dtype)                        # whole (B, D_OUT)


@jax.jit
def scalegmn_gnn_forward(packed, x, a, e):
    B, N, d_node = x.shape
    f32 = jnp.float32

    # Zero-pad node features to D_HID (layer-0 packed weight rows beyond
    # d_node are zero, so this is exact) -- done here, not in-kernel.
    x2 = jnp.pad(x.reshape(B * N, d_node).astype(f32),
                 ((0, 0), (0, D_HID - d_node)))                 # (BN, D_HID)

    # Dense edge-attr tensor masked by adjacency, flattened so the in-kernel
    # edge reduction is a single matmul against the tiled edge weights.
    e2 = (e * a[..., None]).reshape(B * N, N * D_EDGE).astype(f32)

    # Block-diagonal adjacency built once in the wrapper (cheap DMA, removes
    # in-kernel concat/copy work).
    eye_b = jnp.eye(B, dtype=f32)
    a_bd = (eye_b[:, None, :, None] * a.astype(f32)[:, :, None, :]
            ).reshape(B * N, B * N)                             # (BN, BN)

    vmem = pl.BlockSpec(memory_space=pltpu.MemorySpace.VMEM)
    return pl.pallas_call(
        _fused_forward_kernel,
        out_shape=jax.ShapeDtypeStruct((B, D_OUT), jnp.float32),
        in_specs=[vmem] * 13,
        out_specs=vmem,
        compiler_params=pltpu.CompilerParams(vmem_limit_bytes=64 << 20),
    )(x2, e2, a_bd,
      packed['whv'], packed['wes'], packed['bias'],
      packed['w1w'], packed['mask'], packed['blocksum'], packed['sel'],
      packed['b1'], packed['w2'], packed['b2'])


# ----------------------- parameter construction (glue) ----------------------
def init_params(key):
    def dense(k, shape, scale=0.1):
        return scale * jax.random.normal(k, shape, dtype=jnp.float32)

    params = {'layers': [], 'skips': [None] * NUM_LAYERS, 'readout': {}}
    for i in range(NUM_LAYERS):
        d_in_v = D_NODE if i == 0 else D_HID        # update_edge_attr = False
        k0, k1, k2, k3, key = jax.random.split(key, 5)
        params['layers'].append({
            'ws': dense(k0, (d_in_v, D_HID)),
            'wn': dense(k1, (d_in_v, D_HID)),
            'we': dense(k2, (D_EDGE, D_HID)),
            'b': dense(k3, (1, D_HID)),
        })
    for i in range(1, NUM_LAYERS):                  # layer-0 skip unused (TODO above)
        ks, key = jax.random.split(key)
        params['skips'][i] = dense(ks, (D_HID, D_HID))
    k1, k2, k3, k4, key = jax.random.split(key, 5)
    params['readout'] = {
        'w1': dense(k1, (D_READOUT_IN, D_READOUT_HID)),
        'b1': dense(k2, (1, D_READOUT_HID)),
        'w2': dense(k3, (D_READOUT_HID, D_OUT)),
        'b2': dense(k4, (1, D_OUT)),
    }
    return params


def pack_params(params):
    """Pack weights ONCE (outside jit) into the fused-kernel layout."""
    f32 = jnp.float32
    whv, wes_cols, bias = [], [], []
    for i, lp in enumerate(params['layers']):
        ws, wn, we = lp['ws'], lp['wn'], lp['we']
        d_in = ws.shape[0]
        if d_in < D_HID:                            # zero-pad layer-0 rows
            pad = ((0, D_HID - d_in), (0, 0))
            ws, wn = jnp.pad(ws, pad), jnp.pad(wn, pad)
        sk = params['skips'][i]
        if sk is None:
            sk = jnp.zeros((D_HID, D_HID), f32)
        # [Ws | Wn | Wskip]: skip matmul fused into the layer matmul.
        whv.append(jnp.concatenate([ws, wn, sk], axis=1))        # (D_HID, 3*D_HID)
        wes_cols.append(jnp.tile(we, (N_NODES, 1)))              # (N*D_EDGE, D_HID)
        bias.append(lp['b'])                                     # (1, D_HID)

    r = params['readout']
    # W1 (LAST*D_HID, D_RH) -> W1_wide (D_HID, LAST*D_RH): block k of columns
    # equals W1[k*D_HID:(k+1)*D_HID, :].
    w1w = jnp.concatenate(
        [r['w1'][k * D_HID:(k + 1) * D_HID, :] for k in range(LAST_LAYER_NODES)],
        axis=1)                                                  # (D_HID, LAST*D_RH)

    # Static batch-layout selection/mask matrices (BATCH is fixed here).
    rows = jnp.arange(BN)
    node_in_graph = rows % N_NODES
    k_of_col = jnp.arange(LAST_LAYER_NODES * D_READOUT_HID) // D_READOUT_HID
    mask = (node_in_graph[:, None] ==
            (LAYER_IDX[-2] + k_of_col)[None, :]).astype(f32)     # (BN, LAST*D_RH)
    sel = ((jnp.arange(BATCH)[:, None] == (rows // N_NODES)[None, :]) &
           (node_in_graph >= LAYER_IDX[-2])[None, :]).astype(f32)  # (B, BN)
    blocksum = jnp.tile(jnp.eye(D_READOUT_HID, dtype=f32),
                        (LAST_LAYER_NODES, 1))                   # (LAST*D_RH, D_RH)

    return {
        'whv': jnp.stack(whv),                      # (L, D_HID, 3*D_HID)
        'wes': jnp.concatenate(wes_cols, axis=1),   # (N*D_EDGE, L*D_HID)
        'bias': jnp.stack(bias),                    # (L, 1, D_HID)
        'w1w': w1w, 'mask': mask, 'sel': sel, 'blocksum': blocksum,
        'b1': r['b1'], 'w2': r['w2'], 'b2': r['b2'],
    }


def build_graph(key):
    # Feed-forward MLP graph: edges from every node of layer l to layer l+1.
    a = jnp.zeros((N_NODES, N_NODES), dtype=jnp.float32)
    for l in range(len(LAYER_LAYOUT) - 1):
        src = slice(LAYER_IDX[l], LAYER_IDX[l + 1])
        dst = slice(LAYER_IDX[l + 1], LAYER_IDX[l + 2])
        a = a.at[dst, src].set(1.0)                 # A[i, j]=1 for edge j -> i
    a = jnp.broadcast_to(a, (BATCH, N_NODES, N_NODES))
    kx, ke = jax.random.split(key)
    x = jax.random.normal(kx, (BATCH, N_NODES, D_NODE), dtype=jnp.float32)
    # Edge attrs left unmasked here; adjacency masking happens once in the
    # wrapper / reference (no redundant double-mask).
    e = jax.random.normal(ke, (BATCH, N_NODES, N_NODES, D_EDGE),
                          dtype=jnp.float32)
    return x, a, e


# --------------------------- pure-JAX reference ------------------------------
def reference_forward(params, x, a, e):
    ea = jnp.einsum('bij,bije->bie', a, e)
    h = x
    for i in range(NUM_LAYERS):
        p = params['layers'][i]
        h_self = h @ p['ws']
        msg = h @ p['wn']
        h_agg = jnp.einsum('bij,bjd->bid', a, msg)
        h_edge = ea @ p['we']
        h_new = jax.nn.relu(h_self + h_agg + h_edge + p['b'])
        if params['skips'][i] is not None:
            h_new = h_new + h @ params['skips'][i]
        h = h_new
    last = h[:, LAYER_IDX[-2]:LAYER_IDX[-1], :].reshape(x.shape[0], -1)
    r = params['readout']
    return jax.nn.relu(last @ r['w1'] + r['b1']) @ r['w2'] + r['b2']


# ------------------------------- main ----------------------------------------
if __name__ == "__main__":
    key = jax.random.PRNGKey(0)
    kp, kg = jax.random.split(key)
    params = init_params(kp)
    packed = pack_params(params)
    x, a, e = build_graph(kg)

    out = scalegmn_gnn_forward(packed, x, a, e)
    out = jax.block_until_ready(out)

    ref = reference_forward(params, x, a, e)
    assert out.shape == (BATCH, D_OUT)
    assert jnp.all(jnp.isfinite(out))
    # loose tolerance: TPU f32 matmul passes differ slightly between XLA and MXU paths
    assert jnp.allclose(out, ref, rtol=1e-2, atol=1e-2)
    print("KERNEL_OK")
</pallas_src>

<mosaic_0001>
module attributes {stable_mosaic.version = 11 : i64} {
  func.func @_fused_forward_kernel(%arg0: memref<32x32xf32, #tpu.memory_space<vmem>>, %arg1: memref<32x64xf32, #tpu.memory_space<vmem>>, %arg2: memref<32x32xf32, #tpu.memory_space<vmem>>, %arg3: memref<3x32x96xf32, #tpu.memory_space<vmem>>, %arg4: memref<64x96xf32, #tpu.memory_space<vmem>>, %arg5: memref<3x1x32xf32, #tpu.memory_space<vmem>>, %arg6: memref<32x256xf32, #tpu.memory_space<vmem>>, %arg7: memref<32x256xf32, #tpu.memory_space<vmem>>, %arg8: memref<256x64xf32, #tpu.memory_space<vmem>>, %arg9: memref<2x32xf32, #tpu.memory_space<vmem>>, %arg10: memref<1x64xf32, #tpu.memory_space<vmem>>, %arg11: memref<64x8xf32, #tpu.memory_space<vmem>>, %arg12: memref<1x8xf32, #tpu.memory_space<vmem>>, %arg13: memref<2x8xf32, #tpu.memory_space<vmem>>) attributes {dimension_semantics = [], scalar_prefetch = 0 : i64, scratch_operands = 0 : i64, tpu.core_type = #tpu.core_type<tc>} {
    %c0 = arith.constant 0 : index
    %c0_0 = arith.constant 0 : index
    %0 = vector.load %arg0[%c0, %c0_0] : memref<32x32xf32, #tpu.memory_space<vmem>>, vector<32x32xf32>
    %c0_1 = arith.constant 0 : index
    %c0_2 = arith.constant 0 : index
    %1 = vector.load %arg2[%c0_1, %c0_2] : memref<32x32xf32, #tpu.memory_space<vmem>>, vector<32x32xf32>
    %c0_3 = arith.constant 0 : index
    %c0_4 = arith.constant 0 : index
    %2 = vector.load %arg1[%c0_3, %c0_4] : memref<32x64xf32, #tpu.memory_space<vmem>>, vector<32x64xf32>
    %c0_5 = arith.constant 0 : index
    %c0_6 = arith.constant 0 : index
    %3 = vector.load %arg4[%c0_5, %c0_6] : memref<64x96xf32, #tpu.memory_space<vmem>>, vector<64x96xf32>
    %cst = arith.constant dense<0.000000e+00> : vector<32x96xf32>
    %4 = tpu.matmul %2, %3, %cst {dimension_numbers = #tpu.dot_dimension_numbers<[1], [0], [0], [1], [0, 0, 1, 1], [], []>} : vector<32x64xf32>, vector<64x96xf32>, vector<32x96xf32> -> vector<32x96xf32>
    %c0_7 = arith.constant 0 : index
    %c0_8 = arith.constant 0 : index
    %c0_9 = arith.constant 0 : index
    %5 = vector.load %arg3[%c0_7, %c0_8, %c0_9] : memref<3x32x96xf32, #tpu.memory_space<vmem>>, vector<1x32x96xf32>
    %6 = vector.shape_cast %5 : vector<1x32x96xf32> to vector<32x96xf32>
    %cst_10 = arith.constant dense<0.000000e+00> : vector<32x96xf32>
    %7 = tpu.matmul %0, %6, %cst_10 {dimension_numbers = #tpu.dot_dimension_numbers<[1], [0], [0], [1], [0, 0, 1, 1], [], []>} : vector<32x32xf32>, vector<32x96xf32>, vector<32x96xf32> -> vector<32x96xf32>
    %8 = vector.extract_strided_slice %7 {offsets = [0, 0], sizes = [32, 32], strides = [1, 1]} : vector<32x96xf32> to vector<32x32xf32>
    %9 = vector.extract_strided_slice %4 {offsets = [0, 0], sizes = [32, 32], strides = [1, 1]} : vector<32x96xf32> to vector<32x32xf32>
    %10 = arith.addf %8, %9 : vector<32x32xf32>
    %11 = vector.extract_strided_slice %7 {offsets = [0, 32], sizes = [32, 32], strides = [1, 1]} : vector<32x96xf32> to vector<32x32xf32>
    %12 = vector.extract_strided_slice %7 {offsets = [0, 64], sizes = [32, 32], strides = [1, 1]} : vector<32x96xf32> to vector<32x32xf32>
    %cst_11 = arith.constant dense<0.000000e+00> : vector<32x32xf32>
    %13 = tpu.matmul %1, %11, %cst_11 {dimension_numbers = #tpu.dot_dimension_numbers<[1], [0], [0], [1], [0, 0, 1, 1], [], []>} : vector<32x32xf32>, vector<32x32xf32>, vector<32x32xf32> -> vector<32x32xf32>
    %14 = arith.addf %10, %13 : vector<32x32xf32>
    %c0_12 = arith.constant 0 : index
    %c0_13 = arith.constant 0 : index
    %c0_14 = arith.constant 0 : index
    %15 = vector.load %arg5[%c0_12, %c0_13, %c0_14] : memref<3x1x32xf32, #tpu.memory_space<vmem>>, vector<1x1x32xf32>
    %16 = vector.shape_cast %15 : vector<1x1x32xf32> to vector<1x32xf32>
    %17 = vector.broadcast %16 : vector<1x32xf32> to vector<32x32xf32>
    %18 = arith.addf %14, %17 : vector<32x32xf32>
    %cst_15 = arith.constant 0.000000e+00 : f32
    %19 = vector.broadcast %cst_15 : f32 to vector<32x32xf32>
    %20 = arith.maximumf %18, %19 : vector<32x32xf32>
    %21 = arith.addf %20, %12 : vector<32x32xf32>
    %c1 = arith.constant 1 : index
    %c0_16 = arith.constant 0 : index
    %c0_17 = arith.constant 0 : index
    %22 = vector.load %arg3[%c1, %c0_16, %c0_17] : memref<3x32x96xf32, #tpu.memory_space<vmem>>, vector<1x32x96xf32>
    %23 = vector.shape_cast %22 : vector<1x32x96xf32> to vector<32x96xf32>
    %cst_18 = arith.constant dense<0.000000e+00> : vector<32x96xf32>
    %24 = tpu.matmul %21, %23, %cst_18 {dimension_numbers = #tpu.dot_dimension_numbers<[1], [0], [0], [1], [0, 0, 1, 1], [], []>} : vector<32x32xf32>, vector<32x96xf32>, vector<32x96xf32> -> vector<32x96xf32>
    %25 = vector.extract_strided_slice %24 {offsets = [0, 0], sizes = [32, 32], strides = [1, 1]} : vector<32x96xf32> to vector<32x32xf32>
    %26 = vector.extract_strided_slice %4 {offsets = [0, 32], sizes = [32, 32], strides = [1, 1]} : vector<32x96xf32> to vector<32x32xf32>
    %27 = arith.addf %25, %26 : vector<32x32xf32>
    %28 = vector.extract_strided_slice %24 {offsets = [0, 32], sizes = [32, 32], strides = [1, 1]} : vector<32x96xf32> to vector<32x32xf32>
    %29 = vector.extract_strided_slice %24 {offsets = [0, 64], sizes = [32, 32], strides = [1, 1]} : vector<32x96xf32> to vector<32x32xf32>
    %cst_19 = arith.constant dense<0.000000e+00> : vector<32x32xf32>
    %30 = tpu.matmul %1, %28, %cst_19 {dimension_numbers = #tpu.dot_dimension_numbers<[1], [0], [0], [1], [0, 0, 1, 1], [], []>} : vector<32x32xf32>, vector<32x32xf32>, vector<32x32xf32> -> vector<32x32xf32>
    %31 = arith.addf %27, %30 : vector<32x32xf32>
    %c1_20 = arith.constant 1 : index
    %c0_21 = arith.constant 0 : index
    %c0_22 = arith.constant 0 : index
    %32 = vector.load %arg5[%c1_20, %c0_21, %c0_22] : memref<3x1x32xf32, #tpu.memory_space<vmem>>, vector<1x1x32xf32>
    %33 = vector.shape_cast %32 : vector<1x1x32xf32> to vector<1x32xf32>
    %34 = vector.broadcast %33 : vector<1x32xf32> to vector<32x32xf32>
    %35 = arith.addf %31, %34 : vector<32x32xf32>
    %cst_23 = arith.constant 0.000000e+00 : f32
    %36 = vector.broadcast %cst_23 : f32 to vector<32x32xf32>
    %37 = arith.maximumf %35, %36 : vector<32x32xf32>
    %38 = arith.addf %37, %29 : vector<32x32xf32>
    %c2 = arith.constant 2 : index
    %c0_24 = arith.constant 0 : index
    %c0_25 = arith.constant 0 : index
    %39 = vector.load %arg3[%c2, %c0_24, %c0_25] : memref<3x32x96xf32, #tpu.memory_space<vmem>>, vector<1x32x96xf32>
    %40 = vector.shape_cast %39 : vector<1x32x96xf32> to vector<32x96xf32>
    %cst_26 = arith.constant dense<0.000000e+00> : vector<32x96xf32>
    %41 = tpu.matmul %38, %40, %cst_26 {dimension_numbers = #tpu.dot_dimension_numbers<[1], [0], [0], [1], [0, 0, 1, 1], [], []>} : vector<32x32xf32>, vector<32x96xf32>, vector<32x96xf32> -> vector<32x96xf32>
    %42 = vector.extract_strided_slice %41 {offsets = [0, 0], sizes = [32, 32], strides = [1, 1]} : vector<32x96xf32> to vector<32x32xf32>
    %43 = vector.extract_strided_slice %4 {offsets = [0, 64], sizes = [32, 32], strides = [1, 1]} : vector<32x96xf32> to vector<32x32xf32>
    %44 = arith.addf %42, %43 : vector<32x32xf32>
    %45 = vector.extract_strided_slice %41 {offsets = [0, 32], sizes = [32, 32], strides = [1, 1]} : vector<32x96xf32> to vector<32x32xf32>
    %46 = vector.extract_strided_slice %41 {offsets = [0, 64], sizes = [32, 32], strides = [1, 1]} : vector<32x96xf32> to vector<32x32xf32>
    %cst_27 = arith.constant dense<0.000000e+00> : vector<32x32xf32>
    %47 = tpu.matmul %1, %45, %cst_27 {dimension_numbers = #tpu.dot_dimension_numbers<[1], [0], [0], [1], [0, 0, 1, 1], [], []>} : vector<32x32xf32>, vector<32x32xf32>, vector<32x32xf32> -> vector<32x32xf32>
    %48 = arith.addf %44, %47 : vector<32x32xf32>
    %c2_28 = arith.constant 2 : index
    %c0_29 = arith.constant 0 : index
    %c0_30 = arith.constant 0 : index
    %49 = vector.load %arg5[%c2_28, %c0_29, %c0_30] : memref<3x1x32xf32, #tpu.memory_space<vmem>>, vector<1x1x32xf32>
    %50 = vector.shape_cast %49 : vector<1x1x32xf32> to vector<1x32xf32>
    %51 = vector.broadcast %50 : vector<1x32xf32> to vector<32x32xf32>
    %52 = arith.addf %48, %51 : vector<32x32xf32>
    %cst_31 = arith.constant 0.000000e+00 : f32
    %53 = vector.broadcast %cst_31 : f32 to vector<32x32xf32>
    %54 = arith.maximumf %52, %53 : vector<32x32xf32>
    %55 = arith.addf %54, %46 : vector<32x32xf32>
    %c0_32 = arith.constant 0 : index
    %c0_33 = arith.constant 0 : index
    %56 = vector.load %arg6[%c0_32, %c0_33] : memref<32x256xf32, #tpu.memory_space<vmem>>, vector<32x256xf32>
    %cst_34 = arith.constant dense<0.000000e+00> : vector<32x256xf32>
    %57 = tpu.matmul %55, %56, %cst_34 {dimension_numbers = #tpu.dot_dimension_numbers<[1], [0], [0], [1], [0, 0, 1, 1], [], []>} : vector<32x32xf32>, vector<32x256xf32>, vector<32x256xf32> -> vector<32x256xf32>
    %c0_35 = arith.constant 0 : index
    %c0_36 = arith.constant 0 : index
    %58 = vector.load %arg9[%c0_35, %c0_36] : memref<2x32xf32, #tpu.memory_space<vmem>>, vector<2x32xf32>
    %c0_37 = arith.constant 0 : index
    %c0_38 = arith.constant 0 : index
    %59 = vector.load %arg7[%c0_37, %c0_38] : memref<32x256xf32, #tpu.memory_space<vmem>>, vector<32x256xf32>
    %60 = arith.mulf %57, %59 : vector<32x256xf32>
    %cst_39 = arith.constant dense<0.000000e+00> : vector<2x256xf32>
    %61 = tpu.matmul %58, %60, %cst_39 {dimension_numbers = #tpu.dot_dimension_numbers<[1], [0], [0], [1], [0, 0, 1, 1], [], []>} : vector<2x32xf32>, vector<32x256xf32>, vector<2x256xf32> -> vector<2x256xf32>
    %c0_40 = arith.constant 0 : index
    %c0_41 = arith.constant 0 : index
    %62 = vector.load %arg8[%c0_40, %c0_41] : memref<256x64xf32, #tpu.memory_space<vmem>>, vector<256x64xf32>
    %cst_42 = arith.constant dense<0.000000e+00> : vector<2x64xf32>
    %63 = tpu.matmul %61, %62, %cst_42 {dimension_numbers = #tpu.dot_dimension_numbers<[1], [0], [0], [1], [0, 0, 1, 1], [], []>} : vector<2x256xf32>, vector<256x64xf32>, vector<2x64xf32> -> vector<2x64xf32>
    %c0_43 = arith.constant 0 : index
    %c0_44 = arith.constant 0 : index
    %64 = vector.load %arg10[%c0_43, %c0_44] : memref<1x64xf32, #tpu.memory_space<vmem>>, vector<1x64xf32>
    %65 = vector.broadcast %64 : vector<1x64xf32> to vector<2x64xf32>
    %66 = arith.addf %63, %65 : vector<2x64xf32>
    %cst_45 = arith.constant 0.000000e+00 : f32
    %67 = vector.broadcast %cst_45 : f32 to vector<2x64xf32>
    %68 = arith.maximumf %66, %67 : vector<2x64xf32>
    %c0_46 = arith.constant 0 : index
    %c0_47 = arith.constant 0 : index
    %69 = vector.load %arg11[%c0_46, %c0_47] : memref<64x8xf32, #tpu.memory_space<vmem>>, vector<64x8xf32>
    %cst_48 = arith.constant dense<0.000000e+00> : vector<2x8xf32>
    %70 = tpu.matmul %68, %69, %cst_48 {dimension_numbers = #tpu.dot_dimension_numbers<[1], [0], [0], [1], [0, 0, 1, 1], [], []>} : vector<2x64xf32>, vector<64x8xf32>, vector<2x8xf32> -> vector<2x8xf32>
    %c0_49 = arith.constant 0 : index
    %c0_50 = arith.constant 0 : index
    %71 = vector.load %arg12[%c0_49, %c0_50] : memref<1x8xf32, #tpu.memory_space<vmem>>, vector<1x8xf32>
    %72 = vector.broadcast %71 : vector<1x8xf32> to vector<2x8xf32>
    %73 = arith.addf %70, %72 : vector<2x8xf32>
    %c0_51 = arith.constant 0 : index
    %c0_52 = arith.constant 0 : index
    %74 = vector.load %arg13[%c0_51, %c0_52] : memref<2x8xf32, #tpu.memory_space<vmem>>, vector<2x8xf32>
    tpu.vector_store %arg13[%c0_51, %c0_52], %73 {strides = array<i32>} : memref<2x8xf32, #tpu.memory_space<vmem>>, vector<2x8xf32>,
    return
  }
}

</mosaic_0001>

<bundles_post_ra>
// kernel: scalegmn_gnn_forward.1
= control target key start
LH: loop header
LB: loop body
LE: loop exit
PB: predicated region body
PF: predicated region fallthrough
CT: control target
= control target key end

     0   :  { %vm111_vm0 = vcmask 261120   ;;  %s1389_s0 = inlined_call_operand.vmem [shape: f32[32,32], index: 0, kind: input, shape index: {}]   ;;  %s1390_s1 = inlined_call_operand.vmem [shape: f32[32,64], index: 1, kind: input, shape index: {}]   ;;  %s1391_s2 = inlined_call_operand.vmem [shape: f32[32,32], index: 2, kind: input, shape index: {}]   ;;  %s1392_s3 = inlined_call_operand.vmem [shape: f32[3,32,96], index: 3, kind: input, shape index: {}]   ;;  %s1393_s4 = inlined_call_operand.vmem [shape: f32[64,96], index: 4, kind: input, shape index: {}]   ;;  %s1394_s5 = inlined_call_operand.vmem [shape: f32[3,1,32], index: 5, kind: input, shape index: {}]   ;;  %s1395_s6 = inlined_call_operand.vmem [shape: f32[32,256], index: 6, kind: input, shape index: {}]   ;;  %s1396_s7 = inlined_call_operand.vmem [shape: f32[32,256], index: 7, kind: input, shape index: {}]   ;;  %s1397_s8 = inlined_call_operand.vmem [shape: f32[256,64], index: 8, kind: input, shape index: {}]   ;;  %s1398_s9 = inlined_call_operand.vmem [shape: f32[2,32], index: 9, kind: input, shape index: {}]   ;;  %s1399_s10 = inlined_call_operand.vmem [shape: f32[1,64], index: 10, kind: input, shape index: {}]   ;;  %s1400_s11 = inlined_call_operand.vmem [shape: f32[64,8], index: 11, kind: input, shape index: {}]   ;;  %s1401_s12 = inlined_call_operand.vmem [shape: f32[1,8], index: 12, kind: input, shape index: {}]   ;;  %s1402_s13 = inlined_call_operand.hbm [shape: f32[2,8], index: 13, kind: output, shape index: {}]  }
   0x1   :  { %v64_v0 = vld [vmem:[%s1393_s4 + $0x38] sm:$0xff]  ;;  %v63_v2 = vld [vmem:[%s1393_s4 + $0x30] sm:$0xff]  ;;  %v62_v4 = vld [vmem:[%s1393_s4 + $0x28] sm:$0xff] }
   0x2   :  { %v110_v1 = vld [vmem:[%s1392_s3 + $0x18] sm:$0xff]  ;;  %86 = vmatpush.msra.mxu0 %v64_v0  ;;  %v109_v3 = vld [vmem:[%s1392_s3 + $0x10] sm:$0xff]  ;;  %v108_v5 = vld [vmem:[%s1392_s3 + $0x8] sm:$0xff] }
   0x3   :  { %847 = vmatpush.msra.mxu3 %v110_v1  ;;  %136 = vmatpush.msra.mxu1 %v110_v1  ;;  %v61_v6 = vld [vmem:[%s1393_s4 + $0x20] sm:$0xff]  ;;  %v47_v8 = vld [vmem:[%s1389_s0 + $0x10] sm:$0xff]  ;;  %v60_v9 = vld [vmem:[%s1393_s4 + $0x18] sm:$0xff] }
   0x4   :  { %87 = vmatpush.msra.mxu0 %v63_v2  ;;  %v107_v7 = vld [vmem:[%s1392_s3] sm:$0xff]  ;;  %v59_v11 = vld [vmem:[%s1393_s4 + $0x10] sm:$0xff] }
   0x5   :  { %848 = vmatpush.msra.mxu3 %v109_v3  ;;  %137 = vmatpush.msra.mxu1 %v109_v3  ;;  %v45_v10 = vld [vmem:[%s1389_s0] sm:$0xff] }
   0x6   :  { %88 = vmatpush.msra.mxu0 %v62_v4 }
   0x7   :  { %849 = vmatpush.msra.mxu3 %v108_v5  ;;  %138 = vmatpush.msra.mxu1 %v108_v5 }
   0x8   :  { %89 = vmatpush.msra.mxu0 %v61_v6 }
   0x9   :  { %850 = vmatpush.msra.mxu3 %v107_v7  ;;  %139 = vmatpush.msra.mxu1 %v107_v7 }
   0xa   :  { %804 = vmatmul.msk.f32.vlgmr.msra.gmra.mxu3 %vm111_vm0, %v47_v8 }
   0xb   :  { %18 = vsyncpa [#allocation3], 0  ;;  %90 = vmatpush.msra.mxu0 %v60_v9  ;;  %802 = vmatmul.msk.f32.vlgmr.msra.gmra.mxu1 %vm111_vm0, %v45_v10  ;;  %v58_v12 = vld [vmem:[%s1393_s4 + $0x8] sm:$0xff]  ;;  %v57_v13 = vld [vmem:[%s1393_s4] sm:$0xff]  ;;  %vm65_vm1 = vcmask 523264   ;;  %s915_s29 = smov 64  }
   0xc   :  { %v53_v14 = vld [vmem:[%s1390_s1] sm:$0xff]  ;;  %v48_v15 = vld [vmem:[%s1389_s0 + $0x18] sm:$0xff]  ;;  %v46_v16 = vld [vmem:[%s1389_s0 + $0x8] sm:$0xff]  ;;  %s916_s30 = smov 96   ;;  %s917_s19 = smov [#allocation2]   ;;  %vm780_vm2 = vcmask 58368  }
   0xd   :  { %91 = vmatpush.msra.mxu0 %v59_v11  ;;  %v54_v17 = vld [vmem:[%s1390_s1 + $0x8] sm:$0xff]  ;;  %v55_v18 = vld [vmem:[%s1390_s1 + $0x10] sm:$0xff]  ;;  %v56_v19 = vld [vmem:[%s1390_s1 + $0x18] sm:$0xff]  ;;  %s789_s21 = sshll.u32 %s1402_s13, 4  ;;  %s790_s21 = int_to_ptr.hbm [resolvable:$true] %s789_s21 }
   0xe   :  { %v1075_v35 = vld [vmem:[%s1391_s2] sm:$0xff]  ;;  %v1082_v36 = vld [vmem:[%s1391_s2 + $0x8] sm:$0xff]  ;;  %v1089_v37 = vld [vmem:[%s1391_s2 + $0x10] sm:$0xff] }
   0xf   :  { %92 = vmatpush.msra.mxu0 %v58_v12  ;;  %v1096_v38 = vld [vmem:[%s1391_s2 + $0x18] sm:$0xff]  ;;  %v812_v40 = vld [vmem:[%s1392_s3 + $0x30] sm:$0xff]  ;;  %v811_v41 = vld [vmem:[%s1392_s3 + $0x28] sm:$0xff] }
  0x10   :  { %v813_v39 = vld [vmem:[%s1392_s3 + $0x38] sm:$0xff]  ;;  %v810_v42 = vld [vmem:[%s1392_s3 + $0x20] sm:$0xff] }
  0x11   :  { %93 = vmatpush.msra.mxu0 %v57_v13  ;;  %275 = vmatpush.msrb.mxu3 %v813_v39  ;;  %v884_v44 = vld [vmem:[%s1394_s5] ss:$0 sm:$0xff] }
  0x12   :  { %798 = vmatmul.msk.f32.vlgmr.msra.gmra.mxu0 %vm65_vm1, %v53_v14  ;;  %805 = vmatmul.msk.f32.gmra.mxu3 %vm111_vm0, %v48_v15 }
  0x13   :  { %803 = vmatmul.msk.f32.gmra.mxu1 %vm111_vm0, %v46_v16  ;;  %276 = vmatpush.msrb.mxu3 %v812_v40 }
  0x15   :  { %277 = vmatpush.msrb.mxu3 %v811_v41 }
  0x17   :  { %278 = vmatpush.msrb.mxu3 %v810_v42 }
  0x1a   :  { %799 = vmatmul.msk.f32.gmra.mxu0 %vm65_vm1, %v54_v17 }
  0x22   :  { %800 = vmatmul.msk.f32.gmra.mxu0 %vm65_vm1, %v55_v18 }
  0x2a   :  { %801 = vmatmul.msk.f32.gmra.mxu0 %vm65_vm1, %v56_v19 }
  0x88   :  { %v141_v20 = vpop.f32.mrf.mxu1 }
  0x89   :  { %230 = vrot.lane.b32.xlu1 %v141_v20, %s915_s29 }
  0x8d   :  { %v147_v21 = vpop.f32.mrf.mxu3 }
  0x8e   :  { %234 = vrot.lane.b32.xlu2 %v147_v21, %s915_s29 }
  0x8f   :  { %v1058_v23 = vpop.f32.mrf.mxu0 }
  0x90   :  { %v144_v22 = vpop.f32.mrf.mxu1  ;;  %v153_v43 = vadd.f32 %v141_v20, %v1058_v23 }
  0x91   :  { %232 = vrot.lane.b32.xlu1 %v144_v22, %s915_s29  ;;  %v859_v27 = vpack.i.bf16 %v141_v20, %v144_v22 }
  0x95   :  { %v150_v24 = vpop.f32.mrf.mxu3 }
  0x96   :  { %236 = vrot.lane.b32.xlu2 %v150_v24, %s915_s29  ;;  %v854_v25 = vpack.i.bf16 %v147_v21, %v150_v24 }
  0x97   :  { %v1063_v26 = vpop.f32.mrf.mxu0 }
  0x98   :  { %855 = vrot.lane.b32.xlu0 %v854_v25, %s916_s30  ;;  %v154_v51 = vadd.f32 %v144_v22, %v1063_v26  ;;  %v825_v22 = vld [vmem:[%s1392_s3 + $0x50] sm:$0xff] }
  0x9e   :  { %296 = vrot.lane.b32.xlu2 %v1058_v23, %s916_s30 }
  0x9f   :  { %v1068_v28 = vpop.f32.mrf.mxu0 }
  0xa0   :  { %860 = vrot.lane.b32.xlu0 %v859_v27, %s916_s30  ;;  %v155_v57 = vadd.f32 %v147_v21, %v1068_v28  ;;  %v826_v21 = vld [vmem:[%s1392_s3 + $0x58] sm:$0xff] }
  0xa6   :  { %300 = vrot.lane.b32.xlu2 %v1068_v28, %s916_s30 }
  0xa7   :  { %v1120_v62 = vpop.f32.mrf.mxu0 }
  0xa8   :  { %v156_v1 = vadd.f32 %v150_v24, %v1120_v62  ;;  %v823_v24 = vld [vmem:[%s1392_s3 + $0x40] sm:$0xff] }
  0xe8   :  { %v235_v63 = vpop.permute.xlu2 %234 }
  0xf0   :  { %v237_v7 = vpop.permute.xlu2 %236 }
  0xf8   :  { %v297_v25 = vpop.permute.xlu2 %296 }
  0xfb   :  { %v231_v48 = vpop.permute.xlu1 %230 }
 0x103   :  { %v233_v56 = vpop.permute.xlu1 %232 }
 0x10a   :  { %v856_v29 = vpop.permute.xlu0 %855 }
 0x10b   :  { %v857_v30 = vunpack.i.l.bf16 %v856_v29  ;;  %v858_v31 = vunpack.i.h.bf16 %v856_v29 }
 0x10d   :  { %197 = vmatpush.msra.mxu2 %v857_v30 }
 0x10f   :  { %198 = vmatpush.msra.mxu2 %v858_v31 }
 0x112   :  { %v861_v32 = vpop.permute.xlu0 %860 }
 0x113   :  { %v862_v33 = vunpack.i.l.bf16 %v861_v32  ;;  %v863_v34 = vunpack.i.h.bf16 %v861_v32 }
 0x115   :  { %199 = vmatpush.msra.mxu2 %v862_v33 }
 0x117   :  { %200 = vmatpush.msra.mxu2 %v863_v34 }
 0x118   :  { %806 = vmatmul.msk.f32.vlgmr.msra.gmra.mxu2 %vm111_vm0, %v1075_v35 }
 0x119   :  { %419 = vmatpush.msrb.mxu2 %v826_v21 }
 0x11b   :  { %420 = vmatpush.msrb.mxu2 %v825_v22 }
 0x120   :  { %807 = vmatmul.msk.f32.gmra.mxu2 %vm111_vm0, %v1082_v36 }
 0x128   :  { %808 = vmatmul.msk.f32.gmra.mxu2 %vm111_vm0, %v1089_v37 }
 0x130   :  { %809 = vmatmul.msk.f32.gmra.mxu2 %vm111_vm0, %v1096_v38 }
 0x19b   :  { %v202_v45 = vpop.f32.mrf.mxu2 }
 0x19c   :  { %v214_v46 = vadd.f32 %v202_v45, %v153_v43  ;;  %v301_v45 = vpop.permute.xlu2 %300 }
 0x19e   :  { %v222_v47 = vadd.f32 %v884_v44, %v214_v46 }
 0x1a0   :  { %v226_v49 = vmax.f32 %v222_v47, 0.0 }
 0x1a2   :  { %v242_v50 = vadd.f32 %v231_v48, %v226_v49 }
 0x1a3   :  { %v205_v52 = vpop.f32.mrf.mxu2 }
 0x1a4   :  { %v215_v53 = vadd.f32 %v205_v52, %v154_v51  ;;  %814 = vmatmul.msk.f32.vlgmr.msrb.gmra.mxu3 %vm111_vm0, %v242_v50 }
 0x1a6   :  { %v223_v54 = vadd.f32 %v884_v44, %v215_v53 }
 0x1a8   :  { %v227_v55 = vmax.f32 %v223_v54, 0.0 }
 0x1aa   :  { %v243_v58 = vadd.f32 %v233_v56, %v227_v55 }
 0x1ab   :  { %v208_v59 = vpop.f32.mrf.mxu2 }
 0x1ac   :  { %v216_v60 = vadd.f32 %v208_v59, %v155_v57  ;;  %815 = vmatmul.msk.f32.gmra.mxu3 %vm111_vm0, %v243_v58 }
 0x1ae   :  { %v224_v61 = vadd.f32 %v884_v44, %v216_v60 }
 0x1b0   :  { %v228_v0 = vmax.f32 %v224_v61, 0.0 }
 0x1b2   :  { %v244_v2 = vadd.f32 %v235_v63, %v228_v0 }
 0x1b3   :  { %v211_v3 = vpop.f32.mrf.mxu2 }
 0x1b4   :  { %v217_v4 = vadd.f32 %v211_v3, %v156_v1  ;;  %816 = vmatmul.msk.f32.gmra.mxu3 %vm111_vm0, %v244_v2 }
 0x1b6   :  { %v225_v5 = vadd.f32 %v884_v44, %v217_v4 }
 0x1b8   :  { %v229_v6 = vmax.f32 %v225_v5, 0.0 }
 0x1ba   :  { %v245_v8 = vadd.f32 %v237_v7, %v229_v6 }
 0x1bc   :  { %817 = vmatmul.msk.f32.gmra.mxu3 %vm111_vm0, %v245_v8 }
 0x227   :  { %v280_v9 = vpop.f32.mrf.mxu3 }
 0x228   :  { %v308_v27 = vadd.f32 %v297_v25, %v280_v9 }
 0x22f   :  { %v283_v10 = vpop.f32.mrf.mxu3 }
 0x230   :  { %v869_v11 = vpack.i.bf16 %v280_v9, %v283_v10 }
 0x232   :  { %870 = vrot.lane.b32.xlu1 %v869_v11, %s916_s30 }
 0x237   :  { %v286_v12 = vpop.f32.mrf.mxu3 }
 0x238   :  { %378 = vrot.lane.b32.xlu2 %v286_v12, %s915_s29  ;;  %v310_v47 = vadd.f32 %v301_v45, %v286_v12 }
 0x23a   :  { %374 = vrot.lane.b32.xlu1 %v280_v9, %s915_s29 }
 0x23f   :  { %v289_v13 = vpop.f32.mrf.mxu3 }
 0x240   :  { %v864_v14 = vpack.i.bf16 %v286_v12, %v289_v13  ;;  %v530_v12 = vld [vmem:[%s1395_s6] sm:$0xff] }
 0x242   :  { %302 = vrot.lane.b32.xlu1 %v1120_v62, %s916_s30  ;;  %865 = vrot.lane.b32.xlu0 %v864_v14, %s916_s30 }
 0x24a   :  { %298 = vrot.lane.b32.xlu0 %v1063_v26, %s916_s30 }
 0x252   :  { %376 = vrot.lane.b32.xlu0 %v283_v10, %s915_s29 }
 0x25a   :  { %380 = vrot.lane.b32.xlu0 %v289_v13, %s915_s29 }
 0x262   :  { %436 = vrot.lane.b32.xlu0 %v1058_v23, %s915_s29  ;;  %v824_v23 = vld [vmem:[%s1392_s3 + $0x48] sm:$0xff] }
 0x263   :  { %421 = vmatpush.msrb.mxu2 %v824_v23 }
 0x265   :  { %422 = vmatpush.msrb.mxu2 %v823_v24 }
 0x26a   :  { %440 = vrot.lane.b32.xlu0 %v1068_v28, %s915_s29  ;;  %v885_v28 = vld [vmem:[%s1394_s5 + $0x1] ss:$0 sm:$0xff] }
 0x292   :  { %v379_v54 = vpop.permute.xlu2 %378 }
 0x2a4   :  { %v871_v17 = vpop.permute.xlu1 %870 }
 0x2a5   :  { %v872_v19 = vunpack.i.l.bf16 %v871_v17  ;;  %v873_v20 = vunpack.i.h.bf16 %v871_v17 }
 0x2ac   :  { %v375_v34 = vpop.permute.xlu1 %374 }
 0x2b4   :  { %v866_v15 = vpop.permute.xlu0 %865  ;;  %v303_v52 = vpop.permute.xlu1 %302 }
 0x2b5   :  { %v867_v16 = vunpack.i.l.bf16 %v866_v15  ;;  %v868_v18 = vunpack.i.h.bf16 %v866_v15  ;;  %v311_v55 = vadd.f32 %v303_v52, %v289_v13  ;;  %v531_v13 = vld [vmem:[%s1395_s6 + $0x8] sm:$0xff] }
 0x2b7   :  { %340 = vmatpush.msrb.mxu1 %v867_v16  ;;  %v886_v16 = vld [vmem:[%s1394_s5 + $0x2] ss:$0 sm:$0xff] }
 0x2b9   :  { %341 = vmatpush.msrb.mxu1 %v868_v18 }
 0x2bb   :  { %342 = vmatpush.msrb.mxu1 %v872_v19 }
 0x2bc   :  { %v299_v32 = vpop.permute.xlu0 %298 }
 0x2bd   :  { %343 = vmatpush.msrb.mxu1 %v873_v20  ;;  %v309_v39 = vadd.f32 %v299_v32, %v283_v10 }
 0x2be   :  { %818 = vmatmul.msk.f32.vlgmr.msrb.gmra.mxu1 %vm111_vm0, %v1075_v35 }
 0x2c4   :  { %v377_v46 = vpop.permute.xlu0 %376 }
 0x2c6   :  { %819 = vmatmul.msk.f32.gmra.mxu1 %vm111_vm0, %v1082_v36 }
 0x2cc   :  { %v381_v61 = vpop.permute.xlu0 %380 }
 0x2ce   :  { %820 = vmatmul.msk.f32.gmra.mxu1 %vm111_vm0, %v1089_v37 }
 0x2d4   :  { %v437_v14 = vpop.permute.xlu0 %436 }
 0x2d6   :  { %821 = vmatmul.msk.f32.gmra.mxu1 %vm111_vm0, %v1096_v38 }
 0x33b   :  { %v345_v29 = vpop.f32.mrf.mxu1 }
 0x33c   :  { %v357_v30 = vadd.f32 %v345_v29, %v308_v27 }
 0x33e   :  { %v366_v31 = vadd.f32 %v885_v28, %v357_v30  ;;  %v441_v30 = vpop.permute.xlu0 %440 }
 0x340   :  { %v370_v33 = vmax.f32 %v366_v31, 0.0 }
 0x342   :  { %v386_v40 = vadd.f32 %v375_v34, %v370_v33 }
 0x343   :  { %v348_v41 = vpop.f32.mrf.mxu1 }
 0x344   :  { %v358_v42 = vadd.f32 %v348_v41, %v309_v39  ;;  %827 = vmatmul.msk.f32.vlgmr.msrb.gmra.mxu2 %vm111_vm0, %v386_v40 }
 0x346   :  { %v367_v43 = vadd.f32 %v885_v28, %v358_v42 }
 0x348   :  { %v371_v44 = vmax.f32 %v367_v43, 0.0 }
 0x34a   :  { %v387_v48 = vadd.f32 %v377_v46, %v371_v44 }
 0x34b   :  { %v351_v49 = vpop.f32.mrf.mxu1 }
 0x34c   :  { %v359_v50 = vadd.f32 %v351_v49, %v310_v47  ;;  %828 = vmatmul.msk.f32.gmra.mxu2 %vm111_vm0, %v387_v48 }
 0x34e   :  { %v368_v51 = vadd.f32 %v885_v28, %v359_v50 }
 0x350   :  { %v372_v53 = vmax.f32 %v368_v51, 0.0 }
 0x352   :  { %v388_v56 = vadd.f32 %v379_v54, %v372_v53  ;;  %v683_v54 = vld [vmem:[%s1397_s8 + $0x78] sm:$0xff] }
 0x353   :  { %v354_v57 = vpop.f32.mrf.mxu1 }
 0x354   :  { %v360_v58 = vadd.f32 %v354_v57, %v311_v55  ;;  %829 = vmatmul.msk.f32.gmra.mxu2 %vm111_vm0, %v388_v56  ;;  %v682_v55 = vld [vmem:[%s1397_s8 + $0x70] sm:$0xff]  ;;  %v699_v56 = vld [vmem:[%s1397_s8 + $0xf8] sm:$0xff] }
 0x355   :  { %v698_v57 = vld [vmem:[%s1397_s8 + $0xf0] sm:$0xff] }
 0x356   :  { %v369_v59 = vadd.f32 %v885_v28, %v360_v58  ;;  %v681_v58 = vld [vmem:[%s1397_s8 + $0x68] sm:$0xff] }
 0x358   :  { %v373_v60 = vmax.f32 %v369_v59, 0.0  ;;  %v697_v59 = vld [vmem:[%s1397_s8 + $0xe8] sm:$0xff] }
 0x35a   :  { %v389_v63 = vadd.f32 %v381_v61, %v373_v60  ;;  %v680_v60 = vld [vmem:[%s1397_s8 + $0x60] sm:$0xff] }
 0x35b   :  { %v696_v61 = vld [vmem:[%s1397_s8 + $0xe0] sm:$0xff] }
 0x35c   :  { %830 = vmatmul.msk.f32.gmra.mxu2 %vm111_vm0, %v389_v63 }
 0x3c7   :  { %v424_v0 = vpop.f32.mrf.mxu2 }
 0x3c8   :  { %v448_v15 = vadd.f32 %v437_v14, %v424_v0  ;;  %v688_v14 = vld [vmem:[%s1397_s8 + $0xa0] sm:$0xff] }
 0x3cf   :  { %v427_v1 = vpop.f32.mrf.mxu2 }
 0x3d0   :  { %v879_v2 = vpack.i.bf16 %v424_v0, %v427_v1 }
 0x3d2   :  { %880 = vrot.lane.b32.xlu2 %v879_v2, %s916_s30  ;;  %v695_v2 = vld [vmem:[%s1397_s8 + $0xd8] sm:$0xff] }
 0x3d7   :  { %v430_v3 = vpop.f32.mrf.mxu2 }
 0x3d8   :  { %518 = vrot.lane.b32.xlu0 %v430_v3, %s915_s29  ;;  %v450_v32 = vadd.f32 %v441_v30, %v430_v3  ;;  %v609_v30 = vld [vmem:[%s1396_s7] sm:$0xff] }
 0x3da   :  { %514 = vrot.lane.b32.xlu2 %v424_v0, %s915_s29 }
 0x3df   :  { %v1169_v4 = vpop.f32.mrf.mxu2 }
 0x3e0   :  { %v874_v5 = vpack.i.bf16 %v430_v3, %v1169_v4  ;;  %v678_v3 = vld [vmem:[%s1397_s8 + $0x50] sm:$0xff] }
 0x3e2   :  { %442 = vrot.lane.b32.xlu2 %v1120_v62, %s915_s29  ;;  %875 = vrot.lane.b32.xlu1 %v874_v5, %s916_s30  ;;  %v537_v62 = vld [vmem:[%s1395_s6 + $0x38] sm:$0xff]  ;;  %v677_v5 = vld [vmem:[%s1397_s8 + $0x48] sm:$0xff] }
 0x3e3   :  { %591 = vmatpush.msra.mxu1 %v537_v62  ;;  %v674_v62 = vld [vmem:[%s1397_s8 + $0x30] sm:$0xff] }
 0x3ea   :  { %438 = vrot.lane.b32.xlu1 %v1063_v26, %s915_s29  ;;  %v536_v26 = vld [vmem:[%s1395_s6 + $0x30] sm:$0xff] }
 0x3eb   :  { %562 = vmatpush.msrb.mxu0 %v536_v26  ;;  %v691_v26 = vld [vmem:[%s1397_s8 + $0xb8] sm:$0xff] }
 0x3f2   :  { %516 = vrot.lane.b32.xlu1 %v427_v1, %s915_s29 }
 0x3fa   :  { %520 = vrot.lane.b32.xlu1 %v1169_v4, %s915_s29 }
 0x42c   :  { %v881_v8 = vpop.permute.xlu2 %880 }
 0x42d   :  { %v882_v10 = vunpack.i.l.bf16 %v881_v8  ;;  %v883_v11 = vunpack.i.h.bf16 %v881_v8  ;;  %v692_v8 = vld [vmem:[%s1397_s8 + $0xc0] sm:$0xff] }
 0x434   :  { %v515_v22 = vpop.permute.xlu2 %514 }
 0x43c   :  { %v443_v41 = vpop.permute.xlu2 %442 }
 0x43d   :  { %v451_v44 = vadd.f32 %v443_v41, %v1169_v4  ;;  %v694_v4 = vld [vmem:[%s1397_s8 + $0xd0] sm:$0xff] }
 0x44a   :  { %v519_v43 = vpop.permute.xlu0 %518 }
 0x454   :  { %v876_v6 = vpop.permute.xlu1 %875 }
 0x455   :  { %v877_v7 = vunpack.i.l.bf16 %v876_v6  ;;  %v878_v9 = vunpack.i.h.bf16 %v876_v6  ;;  %v693_v6 = vld [vmem:[%s1397_s8 + $0xc8] sm:$0xff] }
 0x457   :  { %480 = vmatpush.msra.mxu3 %v877_v7  ;;  %v676_v7 = vld [vmem:[%s1397_s8 + $0x40] sm:$0xff] }
 0x459   :  { %481 = vmatpush.msra.mxu3 %v878_v9 }
 0x45b   :  { %482 = vmatpush.msra.mxu3 %v882_v10 }
 0x45c   :  { %v439_v20 = vpop.permute.xlu1 %438 }
 0x45d   :  { %483 = vmatpush.msra.mxu3 %v883_v11  ;;  %v449_v23 = vadd.f32 %v439_v20, %v427_v1  ;;  %v679_v1 = vld [vmem:[%s1397_s8 + $0x58] sm:$0xff] }
 0x45e   :  { %831 = vmatmul.msk.f32.vlgmr.msra.gmra.mxu3 %vm111_vm0, %v1075_v35  ;;  %v534_v35 = vld [vmem:[%s1395_s6 + $0x20] sm:$0xff]  ;;  %v675_v11 = vld [vmem:[%s1397_s8 + $0x38] sm:$0xff] }
 0x45f   :  { %563 = vmatpush.msrb.mxu0 %v534_v35  ;;  %v690_v35 = vld [vmem:[%s1397_s8 + $0xb0] sm:$0xff] }
 0x464   :  { %v517_v31 = vpop.permute.xlu1 %516 }
 0x466   :  { %832 = vmatmul.msk.f32.gmra.mxu3 %vm111_vm0, %v1082_v36  ;;  %v535_v36 = vld [vmem:[%s1395_s6 + $0x28] sm:$0xff] }
 0x467   :  { %592 = vmatpush.msra.mxu1 %v535_v36  ;;  %v673_v36 = vld [vmem:[%s1397_s8 + $0x28] sm:$0xff] }
 0x46c   :  { %v521_v50 = vpop.permute.xlu1 %520 }
 0x46e   :  { %833 = vmatmul.msk.f32.gmra.mxu3 %vm111_vm0, %v1089_v37  ;;  %v532_v37 = vld [vmem:[%s1395_s6 + $0x10] sm:$0xff] }
 0x46f   :  { %564 = vmatpush.msrb.mxu0 %v532_v37  ;;  %v689_v37 = vld [vmem:[%s1397_s8 + $0xa8] sm:$0xff] }
 0x471   :  { %565 = vmatpush.msrb.mxu0 %v530_v12  ;;  %v616_v12 = vld [vmem:[%s1396_s7 + $0x38] sm:$0xff] }
 0x473   :  { %704 = vmatpush.msra.mxu0 %v683_v54  ;;  %v745_v54 = vld [vmem:[%s1400_s11] sm:$0xff] }
 0x475   :  { %705 = vmatpush.msra.mxu0 %v682_v55  ;;  %v887_v55 = vld [vmem:[%s1399_s10] ss:$0 sm:$0xff] }
 0x476   :  { %834 = vmatmul.msk.f32.gmra.mxu3 %vm111_vm0, %v1096_v38  ;;  %v533_v38 = vld [vmem:[%s1395_s6 + $0x18] sm:$0xff] }
 0x477   :  { %593 = vmatpush.msra.mxu1 %v533_v38  ;;  %706 = vmatpush.msra.mxu0 %v681_v58  ;;  %v615_v38 = vld [vmem:[%s1396_s7 + $0x30] sm:$0xff] }
 0x479   :  { %594 = vmatpush.msra.mxu1 %v531_v13  ;;  %707 = vmatpush.msra.mxu0 %v680_v60  ;;  %v672_v13 = vld [vmem:[%s1397_s8 + $0x20] sm:$0xff] }
 0x47b   :  { %724 = vmatpush.msrb.mxu1 %v699_v56  ;;  %708 = vmatpush.msra.mxu0 %v679_v1 }
 0x47d   :  { %725 = vmatpush.msrb.mxu1 %v698_v57  ;;  %709 = vmatpush.msra.mxu0 %v678_v3 }
 0x47f   :  { %726 = vmatpush.msrb.mxu1 %v697_v59  ;;  %710 = vmatpush.msra.mxu0 %v677_v5 }
 0x481   :  { %727 = vmatpush.msrb.mxu1 %v696_v61  ;;  %711 = vmatpush.msra.mxu0 %v676_v7  ;;  %v888_v61 = vld [vmem:[%s1401_s12] ss:$0 sm:$0xff] }
 0x483   :  { %728 = vmatpush.msrb.mxu1 %v695_v2  ;;  %712 = vmatpush.msra.mxu0 %v675_v11 }
 0x485   :  { %729 = vmatpush.msrb.mxu1 %v694_v4  ;;  %713 = vmatpush.msra.mxu0 %v674_v62 }
 0x487   :  { %730 = vmatpush.msrb.mxu1 %v693_v6  ;;  %714 = vmatpush.msra.mxu0 %v673_v36 }
 0x489   :  { %731 = vmatpush.msrb.mxu1 %v692_v8  ;;  %715 = vmatpush.msra.mxu0 %v672_v13 }
 0x48b   :  { %732 = vmatpush.msrb.mxu1 %v691_v26 }
 0x48d   :  { %733 = vmatpush.msrb.mxu1 %v690_v35 }
 0x48f   :  { %734 = vmatpush.msrb.mxu1 %v689_v37 }
 0x491   :  { %735 = vmatpush.msrb.mxu1 %v688_v14 }
 0x4e1   :  { %v485_v17 = vpop.f32.mrf.mxu3 }
 0x4e2   :  { %v497_v18 = vadd.f32 %v485_v17, %v448_v15  ;;  %v613_v15 = vld [vmem:[%s1396_s7 + $0x20] sm:$0xff] }
 0x4e4   :  { %v506_v19 = vadd.f32 %v886_v16, %v497_v18 }
 0x4e6   :  { %v510_v21 = vmax.f32 %v506_v19, 0.0 }
 0x4e8   :  { %v526_v24 = vadd.f32 %v515_v22, %v510_v21  ;;  %v671_v21 = vld [vmem:[%s1397_s8 + $0x18] sm:$0xff] }
 0x4e9   :  { %v488_v25 = vpop.f32.mrf.mxu3  ;;  %v687_v22 = vld [vmem:[%s1397_s8 + $0x98] sm:$0xff]  ;;  %716 = vmatpush.msra.mxu0 %v671_v21 }
 0x4ea   :  { %v498_v27 = vadd.f32 %v488_v25, %v449_v23  ;;  %836 = vmatmul.msk.f32.vlgmr.msrb.gmra.mxu0 %vm111_vm0, %v526_v24  ;;  %840 = vmatmul.msk.f32.vlgmr.msra.gmra.mxu1 %vm111_vm0, %v526_v24  ;;  %v611_v23 = vld [vmem:[%s1396_s7 + $0x10] sm:$0xff]  ;;  %v612_v24 = vld [vmem:[%s1396_s7 + $0x18] sm:$0xff] }
 0x4eb   :  { %736 = vmatpush.msrb.mxu1 %v687_v22 }
 0x4ec   :  { %v507_v28 = vadd.f32 %v886_v16, %v498_v27 }
 0x4ee   :  { %v511_v29 = vmax.f32 %v507_v28, 0.0  ;;  %v670_v28 = vld [vmem:[%s1397_s8 + $0x10] sm:$0xff] }
 0x4ef   :  { %717 = vmatpush.msra.mxu0 %v670_v28 }
 0x4f0   :  { %v527_v33 = vadd.f32 %v517_v31, %v511_v29  ;;  %v686_v29 = vld [vmem:[%s1397_s8 + $0x90] sm:$0xff]  ;;  %v610_v31 = vld [vmem:[%s1396_s7 + $0x8] sm:$0xff] }
 0x4f1   :  { %v491_v34 = vpop.f32.mrf.mxu3  ;;  %737 = vmatpush.msrb.mxu1 %v686_v29 }
 0x4f2   :  { %v499_v39 = vadd.f32 %v491_v34, %v450_v32  ;;  %837 = vmatmul.msk.f32.gmra.mxu0 %vm111_vm0, %v527_v33  ;;  %841 = vmatmul.msk.f32.gmra.mxu1 %vm111_vm0, %v527_v33  ;;  %v669_v34 = vld [vmem:[%s1397_s8 + $0x8] sm:$0xff] }
 0x4f3   :  { %718 = vmatpush.msra.mxu0 %v669_v34 }
 0x4f4   :  { %v508_v40 = vadd.f32 %v886_v16, %v499_v39  ;;  %v685_v39 = vld [vmem:[%s1397_s8 + $0x88] sm:$0xff] }
 0x4f5   :  { %738 = vmatpush.msrb.mxu1 %v685_v39 }
 0x4f6   :  { %v512_v42 = vmax.f32 %v508_v40, 0.0 }
 0x4f8   :  { %v528_v45 = vadd.f32 %v519_v43, %v512_v42  ;;  %v608_v42 = vld [vmem:[%s1398_s9] sm:$0x3] }
 0x4f9   :  { %v494_v46 = vpop.f32.mrf.mxu3  ;;  %v668_v43 = vld [vmem:[%s1397_s8] sm:$0xff] }
 0x4fa   :  { %v500_v47 = vadd.f32 %v494_v46, %v451_v44  ;;  %838 = vmatmul.msk.f32.gmra.mxu0 %vm111_vm0, %v528_v45  ;;  %842 = vmatmul.msk.f32.gmra.mxu1 %vm111_vm0, %v528_v45  ;;  %v684_v44 = vld [vmem:[%s1397_s8 + $0x80] sm:$0xff]  ;;  %v752_v45 = vld [vmem:[%s1400_s11 + $0x38] sm:$0xff]  ;;  %v751_v46 = vld [vmem:[%s1400_s11 + $0x30] sm:$0xff] }
 0x4fb   :  { %719 = vmatpush.msra.mxu0 %v668_v43  ;;  %739 = vmatpush.msrb.mxu1 %v684_v44 }
 0x4fc   :  { %v509_v48 = vadd.f32 %v886_v16, %v500_v47  ;;  %v614_v16 = vld [vmem:[%s1396_s7 + $0x28] sm:$0xff]  ;;  %s787_s7 = sshll.u32 %s917_s19, 4  ;;  %s788_s7 = int_to_ptr.vmem [resolvable:$true] %s787_s7 }
 0x4fd   :  { %v750_v47 = vld [vmem:[%s1400_s11 + $0x28] sm:$0xff] }
 0x4fe   :  { %v513_v49 = vmax.f32 %v509_v48, 0.0  ;;  %v749_v48 = vld [vmem:[%s1400_s11 + $0x20] sm:$0xff] }
 0x500   :  { %v529_v51 = vadd.f32 %v521_v50, %v513_v49 }
 0x502   :  { %839 = vmatmul.msk.f32.gmra.mxu0 %vm111_vm0, %v529_v51  ;;  %843 = vmatmul.msk.f32.gmra.mxu1 %vm111_vm0, %v529_v51  ;;  %v748_v51 = vld [vmem:[%s1400_s11 + $0x18] sm:$0xff] }
 0x567   :  { %v1224_v52 = vpop.f32.mrf.mxu0  ;;  %v1226_v53 = vpop.f32.mrf.mxu1 }
 0x568   :  { %v617_v40 = vmul.f32 %v609_v30, %v1224_v52  ;;  %v618_v41 = vmul.f32 %v610_v31, %v1226_v53  ;;  %v747_v52 = vld [vmem:[%s1400_s11 + $0x10] sm:$0xff]  ;;  %v746_v53 = vld [vmem:[%s1400_s11 + $0x8] sm:$0xff] }
 0x56f   :  { %v570_v63 = vpop.f32.mrf.mxu0  ;;  %v599_v0 = vpop.f32.mrf.mxu1 }
 0x570   :  { %v619_v32 = vmul.f32 %v611_v23, %v570_v63  ;;  %v620_v33 = vmul.f32 %v612_v24, %v599_v0 }
 0x577   :  { %v573_v9 = vpop.f32.mrf.mxu0  ;;  %v602_v10 = vpop.f32.mrf.mxu1 }
 0x578   :  { %v621_v25 = vmul.f32 %v613_v15, %v573_v9  ;;  %v622_v27 = vmul.f32 %v614_v16, %v602_v10 }
 0x57f   :  { %v576_v17 = vpop.f32.mrf.mxu0  ;;  %v605_v18 = vpop.f32.mrf.mxu1 }
 0x580   :  { %v623_v19 = vmul.f32 %v615_v38, %v576_v17  ;;  %v624_v20 = vmul.f32 %v616_v12, %v605_v18 }
 0x582   :  { %640 = vmatpush.msra.mxu2 %v623_v19  ;;  %660 = vmatpush.msrb.mxu3 %v624_v20 }
 0x584   :  { %641 = vmatpush.msra.mxu2 %v621_v25  ;;  %661 = vmatpush.msrb.mxu3 %v622_v27 }
 0x586   :  { %642 = vmatpush.msra.mxu2 %v619_v32  ;;  %662 = vmatpush.msrb.mxu3 %v620_v33 }
 0x588   :  { %643 = vmatpush.msra.mxu2 %v617_v40  ;;  %663 = vmatpush.msrb.mxu3 %v618_v41 }
 0x589   :  { %844 = vmatmul.msk.f32.vlgmr.msra.gmra.mxu2 %vm111_vm0, %v608_v42  ;;  %845 = vmatmul.msk.f32.vlgmr.msrb.gmra.mxu3 %vm111_vm0, %v608_v42 }
 0x58a   :  { %768 = vmatpush.msrb.mxu2 %v752_v45 }
 0x58c   :  { %769 = vmatpush.msrb.mxu2 %v751_v46 }
 0x58e   :  { %770 = vmatpush.msrb.mxu2 %v750_v47 }
 0x590   :  { %771 = vmatpush.msrb.mxu2 %v749_v48 }
 0x592   :  { %772 = vmatpush.msrb.mxu2 %v748_v51 }
 0x594   :  { %773 = vmatpush.msrb.mxu2 %v747_v52 }
 0x596   :  { %774 = vmatpush.msrb.mxu2 %v746_v53 }
 0x598   :  { %775 = vmatpush.msrb.mxu2 %v745_v54 }
 0x60c   :  { %v645_v49 = vpop.f32.mrf.mxu2  ;;  %v665_v50 = vpop.f32.mrf.mxu3 }
 0x60d   :  { %720 = vmatmul.f32.vlgmr.msra.gmra.mxu0 %v645_v49  ;;  %740 = vmatmul.f32.vlgmr.msrb.gmra.mxu1 %v665_v50 }
 0x68a   :  { %v721_v56 = vpop.f32.mrf.mxu0  ;;  %v741_v57 = vpop.f32.mrf.mxu1 }
 0x68b   :  { %v722_v58 = vadd.f32 %v887_v55, %v721_v56 }
 0x68d   :  { %v742_v59 = vadd.f32 %v741_v57, %v722_v58 }
 0x68f   :  { %v744_v60 = vmax.f32 %v742_v59, 0.0 }
 0x691   :  { %846 = vmatmul.msk.f32.vlgmr.msrb.gmra.mxu2 %vm65_vm1, %v744_v60 }
 0x714   :  { %v777_v63 = vpop.f32.mrf.mxu2 }
 0x715   :  { %v778_v0 = vadd.f32 %v888_v61, %v777_v63 }
 0x717   :  { %781 = vst.msk [vmem:[#allocation2] sm:$0x3] %vm780_vm2, %v778_v0 }
 0x718   :  { %792 = dma.vmem_to_hbm [thread:$0]  %s788_s7, 32, %s790_s21, [#allocation3]  }
 0x719   :  { %913 = dma.done.wait [#allocation3], 32  }
 0x71a   :  { %914 = vsyncadd [#allocation3], 4294967264 }
 0x71b   :  { %797 = vsyncpa [#allocation3], 1 }

</bundles_post_ra>
